<compile_context>
chip_gen: v5e
topology: v5e:2x2
jax: 0.10.0
libtpu: 0.0.40
codegen_flags: <defaults>
</compile_context>

<pallas_src>
import functools
import math

import jax
import jax.numpy as jnp
from jax.experimental import pallas as pl
from jax.experimental.pallas import tpu as pltpu


# ----------------------------------------------------------------------------
# Fused kernel: ReLU -> global average pool -> linear head -> BCE-with-logits
#   x_ref      : (Bt, C, HW)   feature block, native NCHW layout (HW on lanes)
#   w_ref      : (C, Np)       head weight, transposed + zero-padded to Np lanes
#   b_ref      : (1, Np)       head bias, zero-padded
#   y_ref      : (Bt, Np)      labels, zero-padded
#   logits_ref : (Bt, Np)      output logits (lane-dense)
#   loss_ref   : (1,)  SMEM    scalar mean BCE loss
#   acc_ref    : (1,)  SMEM    running loss-sum accumulator across grid steps
# ----------------------------------------------------------------------------
def _head_loss_kernel(x_ref, w_ref, b_ref, y_ref, logits_ref, loss_ref, acc_ref,
                      *, n_valid, inv_hw, inv_bn):
    i = pl.program_id(0)

    @pl.when(i == 0)
    def _init():
        acc_ref[0] = jnp.float32(0.0)

    # ReLU, then sum over the lane axis (HW); 1/HW is folded in after the dot.
    x = jnp.maximum(x_ref[...].astype(jnp.float32), 0.0)
    pooled = jnp.sum(x, axis=-1)                                        # (Bt, C)
    z = jnp.dot(pooled, w_ref[...], preferred_element_type=jnp.float32)
    z = z * inv_hw + b_ref[...]                                         # (Bt, Np)
    logits_ref[...] = z.astype(logits_ref.dtype)

    # Stable BCE-with-logits; mask out the zero-padded class lanes.
    y = y_ref[...].astype(jnp.float32)
    per = jnp.maximum(z, 0.0) - z * y + jnp.log1p(jnp.exp(-jnp.abs(z)))
    mask = jax.lax.broadcasted_iota(jnp.int32, per.shape, 1) < n_valid
    acc_ref[0] += jnp.sum(jnp.where(mask, per, 0.0))

    @pl.when(i == pl.num_programs(0) - 1)
    def _finalize():
        loss_ref[0] = acc_ref[0] * inv_bn


# ----------------------------------------------------------------------------
# Logits-only kernel (labels=None path).
# ----------------------------------------------------------------------------
def _head_kernel(x_ref, w_ref, b_ref, logits_ref, *, inv_hw):
    x = jnp.maximum(x_ref[...].astype(jnp.float32), 0.0)
    pooled = jnp.sum(x, axis=-1)                                        # (Bt, C)
    z = jnp.dot(pooled, w_ref[...], preferred_element_type=jnp.float32)
    logits_ref[...] = (z * inv_hw + b_ref[...]).astype(logits_ref.dtype)


def _pick_batch_block(B, C, HW, vmem_budget_bytes=8 << 20):
    """Largest divisor of B whose double-buffered (Bt, C, HW) f32 block fits the budget.

    ~8 MiB keeps us under the v5e 16 MiB scoped-VMEM default and well within
    v7x's 64 MiB physical VMEM without touching vmem_limit_bytes.
    """
    per_img = 2 * C * HW * 4  # 2x double-buffered f32 image block
    bt = max(1, min(B, vmem_budget_bytes // per_img))
    while B % bt:
        bt -= 1
    return bt


def classifier_forward(feats_nchw, w, b, labels=None):
    """feats_nchw: (B, C, H, W) backbone features; w: (N, C); b: (N,).

    Returns logits (B, N) if labels is None, else (loss, logits) — matching
    Classifier.forward semantics (densenet single-image path).
    """
    B, C, H, W = feats_nchw.shape
    N = w.shape[0]
    HW = H * W
    # Native NCHW layout: contiguous (zero-copy) reshape, HW on the 128-lane axis.
    x = feats_nchw.reshape(B, C, HW)

    # Lane-dense head: zero-pad the class dim to a multiple of 128.
    Np = 128 * pl.cdiv(N, 128)
    w_t = jnp.zeros((C, Np), jnp.float32).at[:, :N].set(jnp.transpose(w, (1, 0)))
    b_p = jnp.zeros((1, Np), jnp.float32).at[:, :N].set(b.reshape(1, N).astype(jnp.float32))

    Bt = _pick_batch_block(B, C, HW)
    grid = (B // Bt,)
    inv_hw = 1.0 / HW

    x_spec = pl.BlockSpec((Bt, C, HW), lambda i: (i, 0, 0))
    w_spec = pl.BlockSpec((C, Np), lambda i: (0, 0))
    b_spec = pl.BlockSpec((1, Np), lambda i: (0, 0))
    logits_spec = pl.BlockSpec((Bt, Np), lambda i: (i, 0))

    if labels is None:
        logits = pl.pallas_call(
            functools.partial(_head_kernel, inv_hw=inv_hw),
            out_shape=jax.ShapeDtypeStruct((B, Np), jnp.float32),
            grid_spec=pltpu.PrefetchScalarGridSpec(
                num_scalar_prefetch=0,
                grid=grid,
                in_specs=[x_spec, w_spec, b_spec],
                out_specs=logits_spec),
            compiler_params=pltpu.CompilerParams(
                dimension_semantics=("parallel",)),
        )(x, w_t, b_p)
        return logits[:, :N]

    y_p = jnp.zeros((B, Np), jnp.float32).at[:, :N].set(labels.astype(jnp.float32))
    logits, loss = pl.pallas_call(
        functools.partial(_head_loss_kernel, n_valid=N, inv_hw=inv_hw,
                          inv_bn=1.0 / (B * N)),
        out_shape=(jax.ShapeDtypeStruct((B, Np), jnp.float32),
                   jax.ShapeDtypeStruct((1,), jnp.float32)),
        grid_spec=pltpu.PrefetchScalarGridSpec(
            num_scalar_prefetch=0,
            grid=grid,
            in_specs=[x_spec, w_spec, b_spec,
                      pl.BlockSpec((Bt, Np), lambda i: (i, 0))],
            out_specs=(logits_spec,
                       pl.BlockSpec(memory_space=pltpu.SMEM)),
            scratch_shapes=[pltpu.SMEM((1,), jnp.float32)]),
        compiler_params=pltpu.CompilerParams(
            # loss accumulates across batch blocks -> reduction axis
            dimension_semantics=("arbitrary",)),
    )(x, w_t, b_p, y_p)
    return loss[0], logits[:, :N]


# ----------------------------------------------------------------------------
# Parameter init (mirrors __init__):
#   head.weight ~ trunc_normal(std = 1/sqrt(num_features * n_classes)), head.bias = 0
# ----------------------------------------------------------------------------
def init_head_params(key, num_features, n_classes):
    std = 1.0 / math.sqrt(num_features * n_classes)
    w = std * jax.random.truncated_normal(
        key, -2.0, 2.0, (n_classes, num_features), dtype=jnp.float32)
    b = jnp.zeros((n_classes,), dtype=jnp.float32)
    return w, b


if __name__ == "__main__":
    key = jax.random.PRNGKey(0)
    k_feat, k_w, k_lab = jax.random.split(key, 3)

    # Small synthetic backbone feature map (stands in for densenet `model.features(images)`):
    B, C, H, W = 2, 128, 16, 16          # num_features = 128, spatial 16x16 (HW = 256 lanes)
    n_classes = 14

    feats = jax.random.normal(k_feat, (B, C, H, W), dtype=jnp.float32)   # NCHW
    labels = (jax.random.uniform(k_lab, (B, n_classes)) > 0.5).astype(jnp.float32)

    w, b = init_head_params(k_w, C, n_classes)

    # labels given -> (loss, logits); labels=None -> logits
    loss, logits = classifier_forward(feats, w, b, labels)
    logits_only = classifier_forward(feats, w, b)
    jax.block_until_ready((loss, logits, logits_only))

    # Plain-JAX reference check.
    relu = jnp.maximum(feats, 0.0).reshape(B, C, H * W)
    avg_ref = jnp.mean(relu, axis=-1)                      # (B, C)
    logits_ref = avg_ref @ w.T + b
    z, y = logits_ref, labels
    loss_ref = jnp.mean(jnp.maximum(z, 0) - z * y + jnp.log1p(jnp.exp(-jnp.abs(z))))

    assert jnp.allclose(logits, logits_ref, atol=1e-5, rtol=1e-5)
    assert jnp.allclose(logits_only, logits_ref, atol=1e-5, rtol=1e-5)
    assert jnp.allclose(loss, loss_ref, atol=1e-5, rtol=1e-5)

    print("KERNEL_OK")
</pallas_src>

<mosaic_0001>
module attributes {stable_mosaic.version = 11 : i64} {
  func.func @_head_loss_kernel(%arg0: i32, %arg1: memref<2x128x256xf32, #tpu.memory_space<vmem>>, %arg2: memref<128x128xf32, #tpu.memory_space<vmem>>, %arg3: memref<1x128xf32, #tpu.memory_space<vmem>>, %arg4: memref<2x128xf32, #tpu.memory_space<vmem>>, %arg5: memref<2x128xf32, #tpu.memory_space<vmem>>, %arg6: memref<1xf32, #tpu.memory_space<smem>>, %arg7: memref<1xf32, #tpu.memory_space<smem>>) attributes {dimension_semantics = [#tpu.dimension_semantics<arbitrary>], iteration_bounds = array<i64: 1>, scalar_prefetch = 0 : i64, scratch_operands = 1 : i64, tpu.core_type = #tpu.core_type<tc>, window_params = [{transform_indices = @transform_0, window_bounds = array<i64: 2, 128, 256>}, {pipeline_mode = #tpu.pipeline_mode<synchronous>, transform_indices = @transform_1, window_bounds = array<i64: 128, 128>}, {pipeline_mode = #tpu.pipeline_mode<synchronous>, transform_indices = @transform_2, window_bounds = array<i64: 1, 128>}, {transform_indices = @transform_3, window_bounds = array<i64: 2, 128>}, {transform_indices = @transform_4, window_bounds = array<i64: 2, 128>}, {transform_indices = @transform_5, window_bounds = array<i64: 1>}]} {
    %c0_i32 = arith.constant 0 : i32
    %0 = arith.cmpi eq, %arg0, %c0_i32 : i32
    %1 = arith.extui %0 : i1 to i32
    %c0_i32_0 = arith.constant 0 : i32
    %2 = arith.cmpi ne, %1, %c0_i32_0 : i32
    scf.if %2 {
      %cst_22 = arith.constant 0.000000e+00 : f32
      %c0_23 = arith.constant 0 : index
      %41 = memref.load %arg7[%c0_23] : memref<1xf32, #tpu.memory_space<smem>>
      memref.store %cst_22, %arg7[%c0_23] : memref<1xf32, #tpu.memory_space<smem>>
    } else {
    }
    %c0 = arith.constant 0 : index
    %c0_1 = arith.constant 0 : index
    %c0_2 = arith.constant 0 : index
    %3 = vector.load %arg1[%c0, %c0_1, %c0_2] : memref<2x128x256xf32, #tpu.memory_space<vmem>>, vector<2x128x256xf32>
    %cst = arith.constant 0.000000e+00 : f32
    %4 = vector.broadcast %cst : f32 to vector<2x128x256xf32>
    %5 = arith.maximumf %3, %4 : vector<2x128x256xf32>
    %cst_3 = arith.constant dense<0.000000e+00> : vector<2x128xf32>
    %6 = vector.multi_reduction <add>, %5, %cst_3 [2] : vector<2x128x256xf32> to vector<2x128xf32>
    %c0_4 = arith.constant 0 : index
    %c0_5 = arith.constant 0 : index
    %7 = vector.load %arg2[%c0_4, %c0_5] : memref<128x128xf32, #tpu.memory_space<vmem>>, vector<128x128xf32>
    %cst_6 = arith.constant dense<0.000000e+00> : vector<2x128xf32>
    %8 = tpu.matmul %6, %7, %cst_6 {dimension_numbers = #tpu.dot_dimension_numbers<[1], [0], [0], [1], [0, 0, 1, 1], [], []>} : vector<2x128xf32>, vector<128x128xf32>, vector<2x128xf32> -> vector<2x128xf32>
    %cst_7 = arith.constant 3.906250e-03 : f32
    %9 = vector.broadcast %cst_7 : f32 to vector<2x128xf32>
    %10 = arith.mulf %8, %9 : vector<2x128xf32>
    %c0_8 = arith.constant 0 : index
    %c0_9 = arith.constant 0 : index
    %11 = vector.load %arg3[%c0_8, %c0_9] : memref<1x128xf32, #tpu.memory_space<vmem>>, vector<1x128xf32>
    %12 = vector.broadcast %11 : vector<1x128xf32> to vector<2x128xf32>
    %13 = arith.addf %10, %12 : vector<2x128xf32>
    %c0_10 = arith.constant 0 : index
    %c0_11 = arith.constant 0 : index
    %14 = vector.load %arg5[%c0_10, %c0_11] : memref<2x128xf32, #tpu.memory_space<vmem>>, vector<2x128xf32>
    tpu.vector_store %arg5[%c0_10, %c0_11], %13 {strides = array<i32>} : memref<2x128xf32, #tpu.memory_space<vmem>>, vector<2x128xf32>,
    %c0_12 = arith.constant 0 : index
    %c0_13 = arith.constant 0 : index
    %15 = vector.load %arg4[%c0_12, %c0_13] : memref<2x128xf32, #tpu.memory_space<vmem>>, vector<2x128xf32>
    %cst_14 = arith.constant 0.000000e+00 : f32
    %16 = vector.broadcast %cst_14 : f32 to vector<2x128xf32>
    %17 = arith.maximumf %13, %16 : vector<2x128xf32>
    %18 = arith.mulf %13, %15 : vector<2x128xf32>
    %19 = arith.subf %17, %18 : vector<2x128xf32>
    %20 = math.absf %13 : vector<2x128xf32>
    %cst_15 = arith.constant 0.000000e+00 : f32
    %21 = vector.broadcast %cst_15 : f32 to vector<2x128xf32>
    %22 = arith.subf %21, %20 : vector<2x128xf32>
    %23 = math.exp %22 : vector<2x128xf32>
    %24 = math.log1p %23 : vector<2x128xf32>
    %25 = arith.addf %19, %24 : vector<2x128xf32>
    %26 = tpu.iota {dimensions = array<i32: 1>} : vector<2x128xi32>
    %c14_i32 = arith.constant 14 : i32
    %27 = vector.broadcast %c14_i32 : i32 to vector<2x128xi32>
    %28 = arith.cmpi slt, %26, %27 : vector<2x128xi32>
    %c0_16 = arith.constant 0 : index
    %29 = memref.load %arg7[%c0_16] : memref<1xf32, #tpu.memory_space<smem>>
    %cst_17 = arith.constant 0.000000e+00 : f32
    %30 = vector.broadcast %cst_17 : f32 to vector<2x128xf32>
    %31 = arith.select %28, %25, %30 : vector<2x128xi1>, vector<2x128xf32>
    %32 = vector.shape_cast %31 : vector<2x128xf32> to vector<1x2x128xf32>
    %cst_18 = arith.constant dense<0.000000e+00> : vector<1xf32>
    %33 = vector.multi_reduction <add>, %32, %cst_18 [1, 2] : vector<1x2x128xf32> to vector<1xf32>
    %34 = vector.shape_cast %33 : vector<1xf32> to vector<1x1x1xf32>
    %35 = vector.extract %34[0, 0, 0] : f32 from vector<1x1x1xf32>
    %36 = arith.addf %29, %35 : f32
    %c0_19 = arith.constant 0 : index
    %37 = memref.load %arg7[%c0_19] : memref<1xf32, #tpu.memory_space<smem>>
    memref.store %36, %arg7[%c0_19] : memref<1xf32, #tpu.memory_space<smem>>
    %c0_i32_20 = arith.constant 0 : i32
    %38 = arith.cmpi eq, %arg0, %c0_i32_20 : i32
    %39 = arith.extui %38 : i1 to i32
    %c0_i32_21 = arith.constant 0 : i32
    %40 = arith.cmpi ne, %39, %c0_i32_21 : i32
    scf.if %40 {
      %c0_22 = arith.constant 0 : index
      %41 = memref.load %arg7[%c0_22] : memref<1xf32, #tpu.memory_space<smem>>
      %cst_23 = arith.constant 0.0357142873 : f32
      %42 = arith.mulf %41, %cst_23 : f32
      %c0_24 = arith.constant 0 : index
      %43 = memref.load %arg6[%c0_24] : memref<1xf32, #tpu.memory_space<smem>>
      memref.store %42, %arg6[%c0_24] : memref<1xf32, #tpu.memory_space<smem>>
    } else {
    }
    return
  }
  func.func @transform_0(%arg0: i32) -> (i32, i32, i32) {
    %c0_i32 = arith.constant 0 : i32
    %c0_i32_0 = arith.constant 0 : i32
    %c0_i32_1 = arith.constant 0 : i32
    return %arg0, %c0_i32, %c0_i32_0 : i32, i32, i32
  }
  func.func @transform_1(%arg0: i32) -> (i32, i32) {
    %c0_i32 = arith.constant 0 : i32
    %c0_i32_0 = arith.constant 0 : i32
    %c0_i32_1 = arith.constant 0 : i32
    return %c0_i32, %c0_i32_0 : i32, i32
  }
  func.func @transform_2(%arg0: i32) -> (i32, i32) {
    %c0_i32 = arith.constant 0 : i32
    %c0_i32_0 = arith.constant 0 : i32
    %c0_i32_1 = arith.constant 0 : i32
    return %c0_i32, %c0_i32_0 : i32, i32
  }
  func.func @transform_3(%arg0: i32) -> (i32, i32) {
    %c0_i32 = arith.constant 0 : i32
    %c0_i32_0 = arith.constant 0 : i32
    return %arg0, %c0_i32 : i32, i32
  }
  func.func @transform_4(%arg0: i32) -> (i32, i32) {
    %c0_i32 = arith.constant 0 : i32
    %c0_i32_0 = arith.constant 0 : i32
    return %arg0, %c0_i32 : i32, i32
  }
  func.func @transform_5(%arg0: i32) -> i32 {
    %c0_i32 = arith.constant 0 : i32
    %c0_i32_0 = arith.constant 0 : i32
    return %c0_i32 : i32
  }
}

</mosaic_0001>

<bundles_post_ra>
// kernel: tpu_custom_call.1
= control target key start
LH: loop header
LB: loop body
LE: loop exit
PB: predicated region body
PF: predicated region fallthrough
CT: control target
= control target key end

     0   :  { %11 = vsyncpa [#allocation4], 0  ;;  %s844_s0 = inlined_call_operand.hbm [shape: f32[2,128,256], index: 0, kind: input, shape index: {}]   ;;  %s845_s1 = inlined_call_operand.hbm [shape: f32[128,128], index: 1, kind: input, shape index: {}]   ;;  %s846_s2 = inlined_call_operand.hbm [shape: f32[1,128], index: 2, kind: input, shape index: {}]   ;;  %s847_s3 = inlined_call_operand.vmem [shape: f32[2,128], index: 3, kind: input, shape index: {}]   ;;  %s848_s4 = inlined_call_operand.hbm [shape: f32[2,128], index: 4, kind: output, shape index: {0}]   ;;  %s849_s5 = inlined_call_operand.hbm [shape: f32[1], index: 5, kind: output, shape index: {1}]  }
   0x1   :  { %12 = vsyncpa [#allocation8], 0 }
   0x2   :  { %13 = vsyncpa [#allocation5], 0  ;;  %s32_s20 = sshll.u32 %s845_s1, 4  ;;  %s33_s20 = int_to_ptr.hbm [resolvable:$true] %s32_s20 }
   0x3   :  { %14 = vsyncpa [#allocation6], 0  ;;  %s675_s21 = smov [#allocation7]   ;;  %s19_s25 = sshll.u32 %s844_s0, 4  ;;  %s20_s25 = int_to_ptr.hbm [resolvable:$true] %s19_s25 }
   0x4   :  { %s34_s22 = sshll.u32 %s675_s21, 4  ;;  %s676_s26 = smov 128   ;;  %s35_s22 = int_to_ptr.vmem [resolvable:$true] %s34_s22 }
   0x5   :  { %s677_s27 = smov 8   ;;  %s678_s28 = smov [#allocation3]  }
   0x6   :  { %40 = dma.hbm_to_vmem [thread:$0]  %s33_s20, 2048, %s35_s22, [#allocation8], %s676_s26, %s676_s26, %s677_s27  }
   0x7   :  { %s21_s29 = sshll.u32 %s678_s28, 4  ;;  %s679_s30 = smov 256   ;;  %s22_s29 = int_to_ptr.vmem [resolvable:$true] %s21_s29 }
   0x8   :  { %s680_s6 = smov 16   ;;  %s46_s8 = sshll.u32 %s846_s2, 4  ;;  %s47_s8 = int_to_ptr.hbm [resolvable:$true] %s46_s8 }
   0x9   :  { %27 = dma.hbm_to_vmem [thread:$0]  %s20_s25, 8192, %s22_s29, [#allocation4], %s679_s30, %s679_s30, %s680_s6  }
   0xa   :  { %s681_s9 = smov [#allocation9]  }
   0xb   :  { %s48_s10 = sshll.u32 %s681_s9, 4  ;;  %s49_s10 = int_to_ptr.vmem [resolvable:$true] %s48_s10 }
   0xc   :  { %51 = dma.hbm_to_vmem [thread:$0]  %s47_s8, 16, %s49_s10, [#allocation8]  }
   0xd   :  { %667 = dma.done.wait [#allocation4], 8192  }
   0xe   :  { %668 = vsyncadd [#allocation4], 4294959104 }
   0xf   :  { %669 = dma.done.wait [#allocation8], 2064  }
  0x10   :  { %670 = vsyncadd [#allocation8], 4294965232  ;;  %v104_v0 = vld [vmem:[#allocation3 + $0x100] sm:$0xff]  ;;  %v105_v1 = vld [vmem:[#allocation3 + $0x108] sm:$0xff]  ;;  %vm349_vm0 = vcmask 130112   ;;  %vm353_vm1 = vcmask 195712  }
  0x11   :  { %v72_v2 = vld [vmem:[#allocation3] sm:$0xff]  ;;  %v168_v3 = vmax.f32 %v104_v0, 0.0  ;;  %v169_v4 = vmax.f32 %v105_v1, 0.0  ;;  %v73_v5 = vld [vmem:[#allocation3 + $0x8] sm:$0xff]  ;;  %v106_v12 = vld [vmem:[#allocation3 + $0x110] sm:$0xff]  ;;  %vm357_vm2 = vcmask 261312  }
  0x12   :  { %v136_v6 = vmax.f32 %v72_v2, 0.0  ;;  %v76_v7 = vld [vmem:[#allocation3 + $0x20] sm:$0xff]  ;;  %v77_v8 = vld [vmem:[#allocation3 + $0x28] sm:$0xff]  ;;  %v137_v9 = vmax.f32 %v73_v5, 0.0  ;;  %v107_v13 = vld [vmem:[#allocation3 + $0x118] sm:$0xff]  ;;  %v170_v21 = vmax.f32 %v106_v12, 0.0 }
  0x13   :  { %v140_v10 = vmax.f32 %v76_v7, 0.0  ;;  %v141_v11 = vmax.f32 %v77_v8, 0.0  ;;  %v74_v14 = vld [vmem:[#allocation3 + $0x10] sm:$0xff]  ;;  %v248_v15 = vadd.f32 %v169_v4, %v168_v3  ;;  %v75_v16 = vld [vmem:[#allocation3 + $0x18] sm:$0xff]  ;;  %v108_v17 = vld [vmem:[#allocation3 + $0x120] sm:$0xff]  ;;  %v171_v22 = vmax.f32 %v107_v13, 0.0 }
  0x14   :  { %v109_v18 = vld [vmem:[#allocation3 + $0x128] sm:$0xff]  ;;  %v200_v19 = vadd.f32 %v137_v9, %v136_v6  ;;  %v138_v23 = vmax.f32 %v74_v14, 0.0  ;;  %v139_v24 = vmax.f32 %v75_v16, 0.0  ;;  %v172_v25 = vmax.f32 %v108_v17, 0.0  ;;  %v110_v30 = vld [vmem:[#allocation3 + $0x130] sm:$0xff]  ;;  %v111_v31 = vld [vmem:[#allocation3 + $0x138] sm:$0xff] }
  0x15   :  { %v206_v20 = vadd.f32 %v141_v11, %v140_v10  ;;  %249 = vadd.xlane.f32.xlu1 %v248_v15  ;;  %v173_v26 = vmax.f32 %v109_v18, 0.0  ;;  %v251_v27 = vadd.f32 %v171_v22, %v170_v21  ;;  %v78_v32 = vld [vmem:[#allocation3 + $0x30] sm:$0xff]  ;;  %v79_v33 = vld [vmem:[#allocation3 + $0x38] sm:$0xff]  ;;  %v80_v34 = vld [vmem:[#allocation3 + $0x40] sm:$0xff]  ;;  %v174_v36 = vmax.f32 %v110_v30, 0.0  ;;  %s682_s11 = smov [#allocation10]  }
  0x16   :  { %201 = vadd.xlane.f32.xlu0 %v200_v19  ;;  %v203_v28 = vadd.f32 %v139_v24, %v138_v23  ;;  %v81_v35 = vld [vmem:[#allocation3 + $0x48] sm:$0xff]  ;;  %v175_v37 = vmax.f32 %v111_v31, 0.0  ;;  %v142_v38 = vmax.f32 %v78_v32, 0.0  ;;  %v143_v39 = vmax.f32 %v79_v33, 0.0  ;;  %v82_v45 = vld [vmem:[#allocation3 + $0x50] sm:$0xff]  ;;  %v83_v46 = vld [vmem:[#allocation3 + $0x58] sm:$0xff] }
  0x17   :  { %207 = vadd.xlane.f32.xlu2 %v206_v20  ;;  %v254_v29 = vadd.f32 %v173_v26, %v172_v25  ;;  %v144_v40 = vmax.f32 %v80_v34, 0.0  ;;  %v145_v41 = vmax.f32 %v81_v35, 0.0  ;;  %v112_v47 = vld [vmem:[#allocation3 + $0x140] sm:$0xff]  ;;  %v113_v48 = vld [vmem:[#allocation3 + $0x148] sm:$0xff]  ;;  %v114_v49 = vld [vmem:[#allocation3 + $0x150] sm:$0xff]  ;;  %v146_v51 = vmax.f32 %v82_v45, 0.0 }
  0x18   :  { %v257_v42 = vadd.f32 %v175_v37, %v174_v36  ;;  %v209_v43 = vadd.f32 %v143_v39, %v142_v38  ;;  %v115_v50 = vld [vmem:[#allocation3 + $0x158] sm:$0xff]  ;;  %v147_v52 = vmax.f32 %v83_v46, 0.0  ;;  %v176_v53 = vmax.f32 %v112_v47, 0.0  ;;  %v116_v60 = vld [vmem:[#allocation3 + $0x160] sm:$0xff]  ;;  %v117_v61 = vld [vmem:[#allocation3 + $0x168] sm:$0xff]  ;;  %s515_s12 = sshll.u32 %s682_s11, 4  ;;  %s516_s12 = int_to_ptr.vmem [resolvable:$true] %s515_s12 }
  0x19   :  { %v212_v44 = vadd.f32 %v145_v41, %v144_v40  ;;  %v177_v54 = vmax.f32 %v113_v48, 0.0  ;;  %v178_v55 = vmax.f32 %v114_v49, 0.0  ;;  %v179_v56 = vmax.f32 %v115_v50, 0.0  ;;  %v84_v62 = vld [vmem:[#allocation3 + $0x60] sm:$0xff]  ;;  %v85_v63 = vld [vmem:[#allocation3 + $0x68] sm:$0xff]  ;;  %v86_v0 = vld [vmem:[#allocation3 + $0x70] sm:$0xff] }
  0x1a   :  { %v215_v57 = vadd.f32 %v147_v52, %v146_v51  ;;  %v87_v1 = vld [vmem:[#allocation3 + $0x78] sm:$0xff]  ;;  %v180_v2 = vmax.f32 %v116_v60, 0.0  ;;  %v181_v3 = vmax.f32 %v117_v61, 0.0  ;;  %v148_v4 = vmax.f32 %v84_v62, 0.0  ;;  %v88_v11 = vld [vmem:[#allocation3 + $0x80] sm:$0xff]  ;;  %v89_v12 = vld [vmem:[#allocation3 + $0x88] sm:$0xff] }
  0x1b   :  { %v260_v58 = vadd.f32 %v177_v54, %v176_v53  ;;  %v263_v59 = vadd.f32 %v179_v56, %v178_v55  ;;  %v149_v5 = vmax.f32 %v85_v63, 0.0  ;;  %v150_v6 = vmax.f32 %v86_v0, 0.0  ;;  %v118_v13 = vld [vmem:[#allocation3 + $0x170] sm:$0xff]  ;;  %v119_v14 = vld [vmem:[#allocation3 + $0x178] sm:$0xff]  ;;  %v120_v15 = vld [vmem:[#allocation3 + $0x180] sm:$0xff]  ;;  %s517_s14 = sshll.u32 %s848_s4, 4  ;;  %s518_s14 = int_to_ptr.hbm [resolvable:$true] %s517_s14 }
  0x1c   :  { %v151_v7 = vmax.f32 %v87_v1, 0.0  ;;  %v266_v8 = vadd.f32 %v181_v3, %v180_v2  ;;  %v121_v16 = vld [vmem:[#allocation3 + $0x188] sm:$0xff]  ;;  %v152_v17 = vmax.f32 %v88_v11, 0.0  ;;  %v153_v18 = vmax.f32 %v89_v12, 0.0  ;;  %v122_v26 = vld [vmem:[#allocation3 + $0x190] sm:$0xff]  ;;  %v92_v30 = vld [vmem:[#allocation3 + $0xa0] sm:$0xff] }
  0x1d   :  { %252 = vadd.xlane.f32.xlu1 %v251_v27  ;;  %v218_v9 = vadd.f32 %v149_v5, %v148_v4  ;;  %v182_v19 = vmax.f32 %v118_v13, 0.0  ;;  %v183_v20 = vmax.f32 %v119_v14, 0.0  ;;  %v184_v21 = vmax.f32 %v120_v15, 0.0  ;;  %v123_v27 = vld [vmem:[#allocation3 + $0x198] sm:$0xff]  ;;  %v93_v31 = vld [vmem:[#allocation3 + $0xa8] sm:$0xff]  ;;  %v94_v41 = vld [vmem:[#allocation3 + $0xb0] sm:$0xff] }
  0x1e   :  { %204 = vadd.xlane.f32.xlu0 %v203_v28  ;;  %v221_v10 = vadd.f32 %v151_v7, %v150_v6  ;;  %v185_v22 = vmax.f32 %v121_v16, 0.0  ;;  %v224_v23 = vadd.f32 %v153_v18, %v152_v17  ;;  %v90_v28 = vld [vmem:[#allocation3 + $0x90] sm:$0xff]  ;;  %v186_v32 = vmax.f32 %v122_v26, 0.0  ;;  %v127_v46 = vld [vmem:[#allocation3 + $0x1b8] sm:$0xff]  ;;  %v128_v56 = vld [vmem:[#allocation3 + $0x1c0] sm:$0xff]  ;;  %s526_s17 = sshll.u32 %s849_s5, 4  ;;  %s527_s17 = int_to_ptr.hbm [resolvable:$true] %s526_s17 }
  0x1f   :  { %255 = vadd.xlane.f32.xlu2 %v254_v29  ;;  %v269_v24 = vadd.f32 %v183_v20, %v182_v19  ;;  %v91_v29 = vld [vmem:[#allocation3 + $0x98] sm:$0xff]  ;;  %v187_v33 = vmax.f32 %v123_v27, 0.0  ;;  %v154_v34 = vmax.f32 %v90_v28, 0.0  ;;  %v156_v36 = vmax.f32 %v92_v30, 0.0  ;;  %v126_v45 = vld [vmem:[#allocation3 + $0x1b0] sm:$0xff]  ;;  %v100_v7 = vld [vmem:[#allocation3 + $0xe0] sm:$0xff] }
  0x20   :  { %v272_v25 = vadd.f32 %v185_v22, %v184_v21  ;;  %v155_v35 = vmax.f32 %v91_v29, 0.0  ;;  %v157_v37 = vmax.f32 %v93_v31, 0.0  ;;  %v158_v47 = vmax.f32 %v94_v41, 0.0  ;;  %v98_v60 = vld [vmem:[#allocation3 + $0xd0] sm:$0xff]  ;;  %v99_v61 = vld [vmem:[#allocation3 + $0xd8] sm:$0xff]  ;;  %v132_v11 = vld [vmem:[#allocation3 + $0x1e0] sm:$0xff] }
  0x21   :  { %v275_v38 = vadd.f32 %v187_v33, %v186_v32  ;;  %v190_v51 = vmax.f32 %v126_v45, 0.0  ;;  %v191_v52 = vmax.f32 %v127_v46, 0.0  ;;  %v192_v62 = vmax.f32 %v128_v56, 0.0  ;;  %v133_v12 = vld [vmem:[#allocation3 + $0x1e8] sm:$0xff]  ;;  %v134_v22 = vld [vmem:[#allocation3 + $0x1f0] sm:$0xff]  ;;  %v311_v41 = vld [vmem:[#allocation7 + $0x78] sm:$0xff] }
  0x22   :  { %v227_v39 = vadd.f32 %v155_v35, %v154_v34  ;;  %v230_v40 = vadd.f32 %v157_v37, %v156_v36  ;;  %v162_v2 = vmax.f32 %v98_v60, 0.0  ;;  %v163_v3 = vmax.f32 %v99_v61, 0.0  ;;  %441 = vmatpush.msra.mxu0 %v311_v41  ;;  %v309_v46 = vld [vmem:[#allocation7 + $0x68] sm:$0xff]  ;;  %v302_v56 = vld [vmem:[#allocation7 + $0x30] sm:$0xff]  ;;  %v300_v61 = vld [vmem:[#allocation7 + $0x20] sm:$0xff]  ;;  %s683_s4 = smov [#allocation11]  }
  0x23   :  { %v281_v55 = vadd.f32 %v191_v52, %v190_v51  ;;  %v164_v13 = vmax.f32 %v100_v7, 0.0  ;;  %v196_v17 = vmax.f32 %v132_v11, 0.0  ;;  %v197_v18 = vmax.f32 %v133_v12, 0.0  ;;  %v301_v60 = vld [vmem:[#allocation7 + $0x28] sm:$0xff] }
  0x24   :  { %v239_v6 = vadd.f32 %v163_v3, %v162_v2  ;;  %v198_v26 = vmax.f32 %v134_v22, 0.0  ;;  %vm361_vm3 = vcmask 326912   ;;  %vm365_vm4 = vcmask 392512  }
  0x25   :  { %258 = vadd.xlane.f32.xlu1 %v257_v42  ;;  %v95_v42 = vld [vmem:[#allocation3 + $0xb8] sm:$0xff]  ;;  %v290_v21 = vadd.f32 %v197_v18, %v196_v17  ;;  %vm369_vm5 = vcmask 458112   ;;  %vm373_vm6 = vcmask 523712   ;;  %vm377_vm7 = vcmask 589312  }
  0x26   :  { %210 = vadd.xlane.f32.xlu0 %v209_v43  ;;  %v124_v43 = vld [vmem:[#allocation3 + $0x1a0] sm:$0xff]  ;;  %v159_v48 = vmax.f32 %v95_v42, 0.0  ;;  %v310_v42 = vld [vmem:[#allocation7 + $0x70] sm:$0xff]  ;;  %vm381_vm8 = vcmask 654912   ;;  %vm385_vm9 = vcmask 720512   ;;  %vm389_vm10 = vcmask 786112  }
  0x27   :  { %213 = vadd.xlane.f32.xlu2 %v212_v44  ;;  %v125_v44 = vld [vmem:[#allocation3 + $0x1a8] sm:$0xff]  ;;  %v188_v49 = vmax.f32 %v124_v43, 0.0  ;;  %442 = vmatpush.msra.mxu0 %v310_v42  ;;  %vm393_vm11 = vcmask 851712   ;;  %vm397_vm12 = vcmask 917312   ;;  %vm401_vm13 = vcmask 982912  }
  0x28   :  { %v189_v50 = vmax.f32 %v125_v44, 0.0  ;;  %v233_v53 = vadd.f32 %v159_v48, %v158_v47  ;;  %v308_v47 = vld [vmem:[#allocation7 + $0x60] sm:$0xff]  ;;  %v307_v48 = vld [vmem:[#allocation7 + $0x58] sm:$0xff]  ;;  %vm405_vm14 = vcmask 1048512   ;;  %vm438_vm15 = vcmask 1041409  }
  0x29   :  { %443 = vmatpush.msra.mxu0 %v309_v46 }
  0x2a   :  { %v278_v54 = vadd.f32 %v189_v50, %v188_v49  ;;  %v306_v49 = vld [vmem:[#allocation7 + $0x50] sm:$0xff] }
  0x2b   :  { %444 = vmatpush.msra.mxu0 %v308_v47 }
  0x2d   :  { %216 = vadd.xlane.f32.xlu1 %v215_v57  ;;  %v129_v57 = vld [vmem:[#allocation3 + $0x1c8] sm:$0xff]  ;;  %445 = vmatpush.msra.mxu0 %v307_v48 }
  0x2e   :  { %261 = vadd.xlane.f32.xlu0 %v260_v58  ;;  %v96_v58 = vld [vmem:[#allocation3 + $0xc0] sm:$0xff]  ;;  %v193_v63 = vmax.f32 %v129_v57, 0.0 }
  0x2f   :  { %264 = vadd.xlane.f32.xlu2 %v263_v59  ;;  %v97_v59 = vld [vmem:[#allocation3 + $0xc8] sm:$0xff]  ;;  %v160_v0 = vmax.f32 %v96_v58, 0.0  ;;  %446 = vmatpush.msra.mxu0 %v306_v49 }
  0x30   :  { %v161_v1 = vmax.f32 %v97_v59, 0.0  ;;  %v284_v4 = vadd.f32 %v193_v63, %v192_v62  ;;  %v299_v62 = vld [vmem:[#allocation7 + $0x18] sm:$0xff]  ;;  %v344_v63 = vlaneseq }
  0x32   :  { %v236_v5 = vadd.f32 %v161_v1, %v160_v0  ;;  %v298_v0 = vld [vmem:[#allocation7 + $0x10] sm:$0xff]  ;;  %v761_v2 = vand.u32 127, %v344_v63 }
  0x34   :  { %v347_v7 = vadd.s32 4294967288, %v761_v2  ;;  %v359_v18 = vadd.s32 4294967264, %v761_v2  ;;  %v379_v42 = vadd.s32 4294967224, %v761_v2  ;;  %v383_v46 = vadd.s32 4294967216, %v761_v2 }
  0x35   :  { %267 = vadd.xlane.f32.xlu1 %v266_v8  ;;  %v101_v8 = vld [vmem:[#allocation3 + $0xe8] sm:$0xff]  ;;  %v387_v47 = vadd.s32 4294967208, %v761_v2 }
  0x36   :  { %219 = vadd.xlane.f32.xlu0 %v218_v9  ;;  %v130_v9 = vld [vmem:[#allocation3 + $0x1d0] sm:$0xff]  ;;  %v165_v14 = vmax.f32 %v101_v8, 0.0 }
  0x37   :  { %222 = vadd.xlane.f32.xlu2 %v221_v10  ;;  %v131_v10 = vld [vmem:[#allocation3 + $0x1d8] sm:$0xff]  ;;  %v194_v15 = vmax.f32 %v130_v9, 0.0  ;;  %v355_v9 = vadd.s32 4294967272, %v761_v2 }
  0x38   :  { %v195_v16 = vmax.f32 %v131_v10, 0.0  ;;  %v242_v19 = vadd.f32 %v165_v14, %v164_v13  ;;  %v351_v10 = vadd.s32 4294967280, %v761_v2 }
  0x3a   :  { %v287_v20 = vadd.f32 %v195_v16, %v194_v15 }
  0x3d   :  { %225 = vadd.xlane.f32.xlu1 %v224_v23  ;;  %v135_v23 = vld [vmem:[#allocation3 + $0x1f8] sm:$0xff] }
  0x3e   :  { %270 = vadd.xlane.f32.xlu0 %v269_v24  ;;  %v102_v24 = vld [vmem:[#allocation3 + $0xf0] sm:$0xff]  ;;  %v199_v27 = vmax.f32 %v135_v23, 0.0 }
  0x3f   :  { %273 = vadd.xlane.f32.xlu2 %v272_v25  ;;  %v103_v25 = vld [vmem:[#allocation3 + $0xf8] sm:$0xff]  ;;  %v166_v28 = vmax.f32 %v102_v24, 0.0 }
  0x40   :  { %v167_v29 = vmax.f32 %v103_v25, 0.0  ;;  %v293_v30 = vadd.f32 %v199_v27, %v198_v26  ;;  %v367_v25 = vadd.s32 4294967248, %v761_v2 }
  0x42   :  { %v245_v31 = vadd.f32 %v167_v29, %v166_v28  ;;  %v371_v28 = vadd.s32 4294967240, %v761_v2  ;;  %v375_v29 = vadd.s32 4294967232, %v761_v2 }
  0x45   :  { %276 = vadd.xlane.f32.xlu1 %v275_v38 }
  0x46   :  { %228 = vadd.xlane.f32.xlu0 %v227_v39 }
  0x47   :  { %231 = vadd.xlane.f32.xlu2 %v230_v40 }
  0x4d   :  { %234 = vadd.xlane.f32.xlu1 %v233_v53  ;;  %v305_v53 = vld [vmem:[#allocation7 + $0x48] sm:$0xff] }
  0x4e   :  { %279 = vadd.xlane.f32.xlu0 %v278_v54  ;;  %447 = vmatpush.msra.mxu0 %v305_v53  ;;  %v304_v54 = vld [vmem:[#allocation7 + $0x40] sm:$0xff] }
  0x4f   :  { %282 = vadd.xlane.f32.xlu2 %v281_v55  ;;  %v303_v55 = vld [vmem:[#allocation7 + $0x38] sm:$0xff] }
  0x50   :  { %448 = vmatpush.msra.mxu0 %v304_v54 }
  0x52   :  { %449 = vmatpush.msra.mxu0 %v303_v55 }
  0x54   :  { %450 = vmatpush.msra.mxu0 %v302_v56 }
  0x55   :  { %285 = vadd.xlane.f32.xlu1 %v284_v4 }
  0x56   :  { %237 = vadd.xlane.f32.xlu0 %v236_v5  ;;  %451 = vmatpush.msra.mxu0 %v301_v60  ;;  %v297_v5 = vld [vmem:[#allocation7 + $0x8] sm:$0xff] }
  0x57   :  { %240 = vadd.xlane.f32.xlu2 %v239_v6  ;;  %v296_v6 = vld [vmem:[#allocation7] sm:$0xff] }
  0x58   :  { %452 = vmatpush.msra.mxu0 %v300_v61  ;;  %v391_v61 = vadd.s32 4294967200, %v761_v2 }
  0x5a   :  { %453 = vmatpush.msra.mxu0 %v299_v62  ;;  %v395_v62 = vadd.s32 4294967192, %v761_v2 }
  0x5c   :  { %454 = vmatpush.msra.mxu0 %v298_v0 }
  0x5d   :  { %243 = vadd.xlane.f32.xlu1 %v242_v19 }
  0x5e   :  { %288 = vadd.xlane.f32.xlu0 %v287_v20  ;;  %455 = vmatpush.msra.mxu0 %v297_v5 }
  0x5f   :  { %291 = vadd.xlane.f32.xlu2 %v290_v21  ;;  %v363_v21 = vadd.s32 4294967256, %v761_v2 }
  0x60   :  { %456 = vmatpush.msra.mxu0 %v296_v6 }
  0x65   :  { %294 = vadd.xlane.f32.xlu1 %v293_v30 }
  0x66   :  { %246 = vadd.xlane.f32.xlu0 %v245_v31 }
  0x88   :  { %v723_v32 = vpop.xlane.xlu1 %249 }
  0x89   :  { %v725_v33 = vpop.xlane.xlu0 %201  ;;  %v407_v13 = vperm.slane %v723_v32, %v761_v2 }
  0x8a   :  { %v727_v34 = vpop.xlane.xlu2 %207  ;;  %v346_v16 = vperm.slane %v725_v33, %v761_v2 }
  0x8b   :  { %v352_v26 = vperm.slane %v727_v34, %v351_v10 }
  0x90   :  { %v729_v35 = vpop.xlane.xlu1 %252 }
  0x91   :  { %v731_v36 = vpop.xlane.xlu0 %204  ;;  %v408_v8 = vperm.slane %v729_v35, %v347_v7 }
  0x92   :  { %v733_v37 = vpop.xlane.xlu2 %255  ;;  %v348_v11 = vperm.slane %v731_v36, %v347_v7 }
  0x93   :  { %v410_v17 = vperm.slane %v733_v37, %v351_v10  ;;  %v409_v19 = vsel %vm349_vm0, %v408_v8, %v407_v13 }
  0x94   :  { %v350_v22 = vsel %vm349_vm0, %v348_v11, %v346_v16 }
  0x95   :  { %v411_v27 = vsel %vm353_vm1, %v410_v17, %v409_v19  ;;  %v354_v31 = vsel %vm353_vm1, %v352_v26, %v350_v22  ;;  %vm486_vm1 = vcmp.lt.s32.totalorder %v761_v2, 14 }
  0x98   :  { %v735_v38 = vpop.xlane.xlu1 %258 }
  0x99   :  { %v737_v39 = vpop.xlane.xlu0 %210  ;;  %v412_v20 = vperm.slane %v735_v38, %v355_v9 }
  0x9a   :  { %v739_v40 = vpop.xlane.xlu2 %213  ;;  %v356_v23 = vperm.slane %v737_v39, %v355_v9 }
  0x9b   :  { %v413_v30 = vsel %vm357_vm2, %v412_v20, %v411_v27  ;;  %v360_v32 = vperm.slane %v739_v40, %v359_v18 }
  0x9c   :  { %v358_v35 = vsel %vm357_vm2, %v356_v23, %v354_v31  ;;  %vm489_vm2 = vcmask 1041408  }
  0xa0   :  { %v741_v43 = vpop.xlane.xlu1 %216 }
  0xa1   :  { %v743_v44 = vpop.xlane.xlu0 %261  ;;  %v364_v34 = vperm.slane %v741_v43, %v363_v21 }
  0xa2   :  { %v745_v45 = vpop.xlane.xlu2 %264  ;;  %v414_v24 = vperm.slane %v743_v44, %v359_v18 }
  0xa3   :  { %v416_v33 = vperm.slane %v745_v45, %v363_v21  ;;  %v362_v45 = vsel %vm361_vm3, %v360_v32, %v358_v35 }
  0xa4   :  { %v415_v36 = vsel %vm361_vm3, %v414_v24, %v413_v30  ;;  %v366_v48 = vsel %vm365_vm4, %v364_v34, %v362_v45 }
  0xa5   :  { %v417_v43 = vsel %vm365_vm4, %v416_v33, %v415_v36  ;;  %v554_v33 = vld [vmem:[#allocation9] ss:$0 sm:$0xff] }
  0xa8   :  { %v747_v50 = vpop.xlane.xlu1 %267 }
  0xa9   :  { %v749_v51 = vpop.xlane.xlu0 %219  ;;  %v418_v37 = vperm.slane %v747_v50, %v367_v25 }
  0xaa   :  { %v751_v52 = vpop.xlane.xlu2 %222  ;;  %v368_v39 = vperm.slane %v749_v51, %v367_v25 }
  0xab   :  { %v419_v49 = vsel %vm369_vm5, %v418_v37, %v417_v43  ;;  %v372_v50 = vperm.slane %v751_v52, %v371_v28 }
  0xac   :  { %v370_v53 = vsel %vm369_vm5, %v368_v39, %v366_v48 }
  0xad   :  { %v374_v52 = vsel %vm373_vm6, %v372_v50, %v370_v53 }
  0xb0   :  { %v753_v57 = vpop.xlane.xlu1 %225 }
  0xb1   :  { %v755_v58 = vpop.xlane.xlu0 %270  ;;  %v376_v54 = vperm.slane %v753_v57, %v375_v29  ;;  %v399_v57 = vadd.s32 4294967184, %v761_v2 }
  0xb2   :  { %v757_v59 = vpop.xlane.xlu2 %273  ;;  %v420_v41 = vperm.slane %v755_v58, %v371_v28 }
  0xb3   :  { %v422_v51 = vperm.slane %v757_v59, %v375_v29  ;;  %v378_v0 = vsel %vm377_vm7, %v376_v54, %v374_v52 }
  0xb4   :  { %v421_v55 = vsel %vm373_vm6, %v420_v41, %v419_v49 }
  0xb5   :  { %v423_v59 = vsel %vm377_vm7, %v422_v51, %v421_v55 }
  0xb8   :  { %v759_v1 = vpop.xlane.xlu1 %276 }
  0xb9   :  { %v763_v3 = vpop.xlane.xlu0 %228  ;;  %v424_v56 = vperm.slane %v759_v1, %v379_v42 }
  0xba   :  { %v765_v4 = vpop.xlane.xlu2 %231  ;;  %v380_v58 = vperm.slane %v763_v3, %v379_v42 }
  0xbb   :  { %v425_v1 = vsel %vm381_vm8, %v424_v56, %v423_v59  ;;  %v384_v3 = vperm.slane %v765_v4, %v383_v46  ;;  %v403_v4 = vadd.s32 4294967176, %v761_v2 }
  0xbc   :  { %v382_v7 = vsel %vm381_vm8, %v380_v58, %v378_v0 }
  0xbd   :  { %v386_v16 = vsel %vm385_vm9, %v384_v3, %v382_v7 }
  0xc0   :  { %v772_v12 = vpop.xlane.xlu1 %234 }
  0xc1   :  { %v776_v14 = vpop.xlane.xlu0 %279  ;;  %v388_v8 = vperm.slane %v772_v12, %v387_v47 }
  0xc2   :  { %v778_v15 = vpop.xlane.xlu2 %282  ;;  %v426_v60 = vperm.slane %v776_v14, %v383_v46 }
  0xc3   :  { %v428_v5 = vperm.slane %v778_v15, %v387_v47  ;;  %v390_v15 = vsel %vm389_vm10, %v388_v8, %v386_v16 }
  0xc4   :  { %v427_v9 = vsel %vm385_vm9, %v426_v60, %v425_v1 }
  0xc5   :  { %v429_v17 = vsel %vm389_vm10, %v428_v5, %v427_v9 }
  0xc8   :  { %v286_v38 = vpop.xlane.xlu1 %285 }
  0xc9   :  { %v238_v44 = vpop.xlane.xlu0 %237  ;;  %v430_v10 = vperm.slane %v286_v38, %v391_v61 }
  0xca   :  { %v241_v40 = vpop.xlane.xlu2 %240  ;;  %v392_v11 = vperm.slane %v238_v44, %v391_v61 }
  0xcb   :  { %v431_v18 = vsel %vm393_vm11, %v430_v10, %v429_v17  ;;  %v396_v19 = vperm.slane %v241_v40, %v395_v62  ;;  %v468_v40 = vld [vmem:[%s847_s3] sm:$0x3] }
  0xcc   :  { %v394_v12 = vsel %vm393_vm11, %v392_v11, %v390_v15 }
  0xcd   :  { %v398_v26 = vsel %vm397_vm12, %v396_v19, %v394_v12 }
  0xd0   :  { %v244_v63 = vpop.xlane.xlu1 %243 }
  0xd1   :  { %v289_v6 = vpop.xlane.xlu0 %288  ;;  %v400_v21 = vperm.slane %v244_v63, %v399_v57 }
  0xd2   :  { %v432_v13 = vperm.slane %v289_v6, %v395_v62  ;;  %v292_v14 = vpop.xlane.xlu2 %291 }
  0xd3   :  { %v434_v20 = vperm.slane %v292_v14, %v399_v57  ;;  %v402_v29 = vsel %vm401_vm13, %v400_v21, %v398_v26 }
  0xd4   :  { %v433_v22 = vsel %vm397_vm12, %v432_v13, %v431_v18 }
  0xd5   :  { %v435_v28 = vsel %vm401_vm13, %v434_v20, %v433_v22 }
  0xd8   :  { %v295_v23 = vpop.xlane.xlu1 %294 }
  0xd9   :  { %v436_v24 = vperm.slane %v295_v23, %v403_v4  ;;  %v247_v25 = vpop.xlane.xlu0 %246 }
  0xda   :  { %v404_v27 = vperm.slane %v247_v25, %v403_v4 }
  0xdb   :  { %v437_v30 = vsel %vm405_vm14, %v436_v24, %v435_v28 }
  0xdc   :  { %v406_v31 = vsel %vm405_vm14, %v404_v27, %v402_v29 }
  0xdd   :  { %v439_v32 = vsel %vm438_vm15, %v437_v30, %v406_v31 }
  0xde   :  { %457 = vmatmul.f32.vlgmr.msra.gmra.mxu0 %v439_v32 }
 0x15b   :  { %v458_v35 = vpop.f32.mrf.mxu0 }
 0x15c   :  { %v461_v34 = vmul.f32 0.00390625, %v458_v35 }
 0x15e   :  { %v466_v36 = vadd.f32 %v554_v33, %v461_v34 }
 0x160   :  { %v472_v37 = vand.u32 2147483647, %v466_v36  ;;  %467 = vst [vmem:[#allocation10] sm:$0x3] %v466_v36  ;;  %v469_v43 = vmax.f32 %v466_v36, 0.0  ;;  %v470_v46 = vmul.f32 %v468_v40, %v466_v36 }
 0x161   :  { %520 = dma.vmem_to_hbm [thread:$0]  %s516_s12, 32, %s518_s14, [#allocation5]  }
 0x162   :  { %v473_v38 = vsub.f32 0.0, %v472_v37  ;;  %v471_v51 = vsub.f32 %v469_v43, %v470_v46 }
 0x164   :  { %v474_v39 = vmul.f32 1.442695, %v473_v38 }
 0x166   :  { %555 = vpow2.f32 %v474_v39 }
 0x16c   :  { %v556_v41 = vpop.eup %555 }
 0x16d   :  { %v476_v42 = vadd.f32 1.0, %v556_v41  ;;  %v479_v44 = vmul.f32 -0.5, %v556_v41  ;;  %v482_v47 = vand.u32 2147483647, %v556_v41 }
 0x16f   :  { %557 = vlog2.f32 %v476_v42  ;;  %v480_v45 = vadd.f32 1.0, %v479_v44  ;;  %vm483_vm0 = vcmp.lt.f32.partialorder %v482_v47, 0.0004427343 }
 0x171   :  { %v481_v50 = vmul.f32 %v556_v41, %v480_v45 }
 0x175   :  { %v558_v48 = vpop.eup %557 }
 0x176   :  { %v478_v49 = vmul.f32 0.6931472, %v558_v48 }
 0x178   :  { %v484_v53 = vsel %vm483_vm0, %v481_v50, %v478_v49 }
 0x179   :  { %v485_v54 = vadd.f32 %v484_v53, %v471_v51 }
 0x17b   :  { %v488_v55 = vsel %vm486_vm1, %v485_v54, 0.0 }
 0x17c   :  { %v490_v56 = vsel %vm489_vm2, %v488_v55, 0.0 }
 0x17d   :  { %491 = vadd.xlane.f32.xlu2 %v490_v56 }
 0x1f0   :  { %v492_v58 = vpop.xlane.xlu2 %491 }
 0x1f1   :  { %v493_v60 = vrot.slane %v492_v58, 4 }
 0x1f3   :  { %v494_v61 = vadd.f32 %v493_v60, %v492_v58 }
 0x1f5   :  { %v495_v52 = vrot.slane %v494_v61, 2 }
 0x1f7   :  { %v496_v59 = vadd.f32 %v495_v52, %v494_v61 }
 0x1f9   :  { %v497_v2 = vrot.slane %v496_v59, 1 }
 0x1fb   :  { %v498_v62 = vadd.f32 %v497_v2, %v496_v59 }
 0x1fd   :  { %543 = vpush %v498_v62 }
 0x22e   :  { %s544_s18 = spop %543 }
 0x22f   :  { %s507_s19 = smul.f32 0.035714287, %s544_s18 }
 0x231   :  { %509 = sst [smem:[#allocation11]] %s507_s19 }
 0x232   :  { %529 = dma.smem_to_hbm %s683_s4, 16, %s527_s17, [#allocation6]  }
 0x233   :  { %671 = dma.done.wait [#allocation5], 32  }
 0x234   :  { %672 = vsyncadd [#allocation5], 4294967264 }
 0x235   :  { %673 = dma.done.wait [#allocation6], 16  }
 0x236   :  { %674 = vsyncadd [#allocation6], 4294967280 }
 0x237   :  { %538 = sfence }
 0x238   :  { %539 = vsyncpa [#allocation4], 1 }
 0x239   :  { %540 = vsyncpa [#allocation8], 1 }
 0x23a   :  { %541 = vsyncpa [#allocation5], 1 }
 0x23b   :  { %542 = vsyncpa [#allocation6], 1 }

</bundles_post_ra>
